<compile_context>
chip_gen: v7x
topology: tpu7x:2x2x1
jax: 0.10.0
libtpu: 0.0.40
codegen_flags: <defaults>
</compile_context>

<pallas_src>
import math

import jax
import jax.numpy as jnp
from jax.experimental import pallas as pl
from jax.experimental.pallas import tpu as pltpu


def _round_up(x, m):
    return ((x + m - 1) // m) * m


def _pad2(a, rows, cols):
    """Zero-pad a 2-D array up to (rows, cols)."""
    r, c = a.shape
    return jnp.zeros((rows, cols), a.dtype).at[:r, :c].set(a)


# ---------------------------------------------------------------------------
# Pallas kernel: the whole 4-layer hnet MLP in one VMEM-resident invocation.
# ---------------------------------------------------------------------------
def _hnet_mlp_kernel(x_ref, w1_ref, w2_ref, w3_ref, w4_ref, b123_ref, b4_ref,
                     o_ref):
    f32 = jnp.float32
    # Weights arrive as bf16 (half the HBM->VMEM bytes); upcast in VMEM and
    # accumulate the matmuls in f32.
    h = jnp.dot(x_ref[...], w1_ref[...].astype(f32),
                preferred_element_type=f32) + b123_ref[0:1, :]
    h = jnp.maximum(h, 0.0)
    h = jnp.dot(h, w2_ref[...].astype(f32),
                preferred_element_type=f32) + b123_ref[1:2, :]
    h = jnp.maximum(h, 0.0)
    h = jnp.dot(h, w3_ref[...].astype(f32),
                preferred_element_type=f32) + b123_ref[2:3, :]
    h = jnp.maximum(h, 0.0)
    # LearnedScale is already folded into w4 / b4 on the host.
    o_ref[...] = (jnp.dot(h, w4_ref[...].astype(f32),
                          preferred_element_type=f32)
                  + b4_ref[0:1, :]).astype(o_ref.dtype)


def hnet_mlp_pallas(x_padded, prep):
    """y = relu(relu(relu(x@W1+b1)@W2+b2)@W3+b3)@W4+b4 on pre-padded operands."""
    Bp, Pp = x_padded.shape
    # No grid: single invocation, whole operands VMEM-resident, single-buffered.
    return pl.pallas_call(
        _hnet_mlp_kernel,
        out_shape=jax.ShapeDtypeStruct((Bp, Pp), jnp.float32),
        compiler_params=pltpu.CompilerParams(
            # Default h_size=1000 bf16 operands (~6 MiB) fit easily; 48 MiB gives
            # headroom on v5e's 16 MiB scoped default while staying under v7x's
            # 64 MiB physical VMEM.
            vmem_limit_bytes=48 * 1024 * 1024,
        ),
    )(x_padded, prep["w1"], prep["w2"], prep["w3"], prep["w4"],
      prep["b123"], prep["b4"])


# ---------------------------------------------------------------------------
# FlattenWeights / UnflattenWeights / LearnedScale (layout + host-side folding)
# ---------------------------------------------------------------------------
def flatten_weight_space(weights, biases):
    """FlattenWeights + Flatten(start_dim=-2), channel dim C == 1 -> (B, num_params)."""
    B = weights[0].shape[0]
    parts = []
    for w, b in zip(weights, biases):
        parts.append(w.reshape(B, -1))   # (B, n_out*n_in)
        parts.append(b.reshape(B, -1))   # (B, n_out)
    return jnp.concatenate(parts, axis=1)


def unflatten_weight_space(y, network_spec):
    """UnflattenWeights: (B, num_params) -> weights (B,1,no,ni) / biases (B,1,no)."""
    B = y.shape[0]
    out_w, out_b = [], []
    off = 0
    for (no, ni) in network_spec:
        out_w.append(y[:, off:off + no * ni].reshape(B, 1, no, ni))
        off += no * ni
        out_b.append(y[:, off:off + no].reshape(B, 1, no))
        off += no
    return out_w, out_b


def _fold_learned_scale(w_last, b_last, network_spec, weight_scales, bias_scales):
    """Fold per-tensor LearnedScale into the last Linear's columns / bias."""
    # TODO(synk): assumes FlattenWeights orders tensors per-layer weight-then-bias,
    #             exactly as flatten_weight_space() above.
    segs = []
    for i, (no, ni) in enumerate(network_spec):
        segs.append(jnp.full((no * ni,), weight_scales[i], jnp.float32))
        segs.append(jnp.full((no,), bias_scales[i], jnp.float32))
    s = jnp.concatenate(segs)                  # (num_params,)
    return w_last * s[None, :], b_last * s


def prepare_mlp_transfer_net(params, network_spec, weight_dtype=jnp.bfloat16):
    """One-time host-side prep: fold LearnedScale into layer 4, zero-pad every
    operand to (8,128)-aligned tiles, cast weights to `weight_dtype` (bf16 by
    default -> halves the streamed bytes of this memory-bound kernel)."""
    P, H = params["w1"].shape
    Pp = _round_up(P, 128)            # lane-align num_params
    Hp = _round_up(H, 128)            # lane-align h_size

    w4f, b4f = _fold_learned_scale(params["w4"], params["b4"], network_spec,
                                   params["weight_scales"], params["bias_scales"])

    b123 = jnp.zeros((8, Hp), jnp.float32)
    b123 = b123.at[0, :H].set(params["b1"].astype(jnp.float32))
    b123 = b123.at[1, :H].set(params["b2"].astype(jnp.float32))
    b123 = b123.at[2, :H].set(params["b3"].astype(jnp.float32))
    b4p = jnp.zeros((8, Pp), jnp.float32).at[0, :P].set(b4f.astype(jnp.float32))

    prep = {
        "w1": _pad2(params["w1"].astype(jnp.float32), Pp, Hp).astype(weight_dtype),
        "w2": _pad2(params["w2"].astype(jnp.float32), Hp, Hp).astype(weight_dtype),
        "w3": _pad2(params["w3"].astype(jnp.float32), Hp, Hp).astype(weight_dtype),
        "w4": _pad2(w4f.astype(jnp.float32), Hp, Pp).astype(weight_dtype),
        "b123": b123,
        "b4": b4p,
        "P": P, "H": H, "Pp": Pp, "Hp": Hp,
    }
    return jax.tree_util.tree_map(jnp.asarray, prep)


def init_mlp_transfer_net_params(key, network_spec, h_size, out_scale=0.01):
    """PyTorch-default Linear init (U(-1/sqrt(fan_in), .)), weights stored (in, out)."""
    num_params = sum(no * ni + no for (no, ni) in network_spec)
    dims = [num_params, h_size, h_size, h_size, num_params]
    params = {}
    for l in range(4):
        fan_in, fan_out = dims[l], dims[l + 1]
        bound = 1.0 / math.sqrt(fan_in)
        key, kw, kb = jax.random.split(key, 3)
        params[f"w{l + 1}"] = jax.random.uniform(kw, (fan_in, fan_out), jnp.float32, -bound, bound)
        params[f"b{l + 1}"] = jax.random.uniform(kb, (fan_out,), jnp.float32, -bound, bound)
    params["weight_scales"] = [jnp.float32(out_scale) for _ in network_spec]
    params["bias_scales"] = [jnp.float32(out_scale) for _ in network_spec]
    return params


def mlp_transfer_net_forward(prep, weights, biases, network_spec):
    """MLPTransferNet.forward on weight-space features (uses cached prepared ops)."""
    x = flatten_weight_space(weights, biases)                       # (B, num_params)
    B, P = x.shape
    Bp = _round_up(max(B, 8), 8)                                    # sublane-align batch
    xp = _pad2(x.astype(jnp.float32), Bp, prep["Pp"])
    y = hnet_mlp_pallas(xp, prep)[:B, :P]
    return unflatten_weight_space(y, network_spec)                  # scale already folded


# ---------------------------------------------------------------------------
# References for validation.
# ---------------------------------------------------------------------------
def matched_reference(prep, x_padded):
    """Pure-JAX reference on the SAME prepared (padded, bf16-cast) operands."""
    hp = jax.lax.Precision.HIGHEST
    f32 = jnp.float32
    h = jnp.maximum(jnp.dot(x_padded, prep["w1"].astype(f32), precision=hp)
                    + prep["b123"][0:1], 0.0)
    h = jnp.maximum(jnp.dot(h, prep["w2"].astype(f32), precision=hp)
                    + prep["b123"][1:2], 0.0)
    h = jnp.maximum(jnp.dot(h, prep["w3"].astype(f32), precision=hp)
                    + prep["b123"][2:3], 0.0)
    return jnp.dot(h, prep["w4"].astype(f32), precision=hp) + prep["b4"][0:1]


def reference_forward(params, weights, biases, network_spec):
    """Full-f32 pure-JAX reference of the original module (unfolded scale order)."""
    hp = jax.lax.Precision.HIGHEST
    x = flatten_weight_space(weights, biases)
    h = jnp.maximum(jnp.dot(x, params["w1"], precision=hp) + params["b1"], 0.0)
    h = jnp.maximum(jnp.dot(h, params["w2"], precision=hp) + params["b2"], 0.0)
    h = jnp.maximum(jnp.dot(h, params["w3"], precision=hp) + params["b3"], 0.0)
    y = jnp.dot(h, params["w4"], precision=hp) + params["b4"]
    out_w, out_b = unflatten_weight_space(y, network_spec)
    out_w = [w * s for w, s in zip(out_w, params["weight_scales"])]
    out_b = [b * s for b, s in zip(out_b, params["bias_scales"])]
    return out_w, out_b


if __name__ == "__main__":
    key = jax.random.PRNGKey(0)
    kp, kd = jax.random.split(key)

    # Underlying INR spec: (n_out, n_in) per layer; num_params = sum(no*ni + no) = 484.
    network_spec = [(16, 8), (16, 16), (4, 16)]
    B = 2
    h_size = 256          # small stand-in for the module default h_size=1000
    out_scale = 0.01

    params = init_mlp_transfer_net_params(kp, network_spec, h_size, out_scale)
    prep = prepare_mlp_transfer_net(params, network_spec)   # one-time, cached

    # Input weight-space features: weights (B, 1, n_out, n_in), biases (B, 1, n_out).
    weights, biases = [], []
    for (no, ni) in network_spec:
        kd, k1, k2 = jax.random.split(kd, 3)
        weights.append(jax.random.normal(k1, (B, 1, no, ni), jnp.float32))
        biases.append(jax.random.normal(k2, (B, 1, no), jnp.float32))

    out_w, out_b = mlp_transfer_net_forward(prep, weights, biases, network_spec)
    jax.block_until_ready((out_w, out_b))

    # --- Check 1: exact math vs. a matched-precision reference (same bf16 weights).
    x = flatten_weight_space(weights, biases)
    P = x.shape[1]
    Bp = _round_up(max(B, 8), 8)
    xp = _pad2(x.astype(jnp.float32), Bp, prep["Pp"])
    y_kernel = hnet_mlp_pallas(xp, prep)[:B, :P]
    y_match = matched_reference(prep, xp)[:B, :P]
    err1 = float(jnp.max(jnp.abs(y_kernel - y_match)))
    mag1 = float(jnp.max(jnp.abs(y_match)))
    assert err1 <= 1e-5 + 1e-3 * mag1, ("matched-precision check failed", err1, mag1)

    # --- Check 2: end-to-end vs. the full-f32 original-module semantics.
    #     Looser tolerance budgets the bf16 weight quantization (~1e-3 relative).
    ref_w, ref_b = reference_forward(params, weights, biases, network_spec)
    max_err, ref_mag = 0.0, 0.0
    for a, r in zip(out_w + out_b, ref_w + ref_b):
        assert a.shape == r.shape
        max_err = max(max_err, float(jnp.max(jnp.abs(a - r))))
        ref_mag = max(ref_mag, float(jnp.max(jnp.abs(r))))
    assert max_err <= 1e-4 + 1e-2 * ref_mag, ("f32-semantics check failed", max_err, ref_mag)

    print("KERNEL_OK")
</pallas_src>

<mosaic_0001>
module attributes {stable_mosaic.version = 11 : i64} {
  func.func @_hnet_mlp_kernel(%arg0: memref<8x512xf32, #tpu.memory_space<vmem>>, %arg1: memref<512x256xbf16, #tpu.memory_space<vmem>>, %arg2: memref<256x256xbf16, #tpu.memory_space<vmem>>, %arg3: memref<256x256xbf16, #tpu.memory_space<vmem>>, %arg4: memref<256x512xbf16, #tpu.memory_space<vmem>>, %arg5: memref<8x256xf32, #tpu.memory_space<vmem>>, %arg6: memref<8x512xf32, #tpu.memory_space<vmem>>, %arg7: memref<8x512xf32, #tpu.memory_space<vmem>>) attributes {dimension_semantics = [], scalar_prefetch = 0 : i64, scratch_operands = 0 : i64, tpu.core_type = #tpu.core_type<tc>} {
    %c0 = arith.constant 0 : index
    %c0_0 = arith.constant 0 : index
    %0 = vector.load %arg0[%c0, %c0_0] : memref<8x512xf32, #tpu.memory_space<vmem>>, vector<8x512xf32>
    %c0_1 = arith.constant 0 : index
    %c0_2 = arith.constant 0 : index
    %1 = vector.load %arg1[%c0_1, %c0_2] : memref<512x256xbf16, #tpu.memory_space<vmem>>, vector<512x256xbf16>
    %2 = arith.extf %1 : vector<512x256xbf16> to vector<512x256xf32>
    %cst = arith.constant dense<0.000000e+00> : vector<8x256xf32>
    %3 = tpu.matmul %0, %2, %cst {dimension_numbers = #tpu.dot_dimension_numbers<[1], [0], [0], [1], [0, 0, 1, 1], [], []>} : vector<8x512xf32>, vector<512x256xf32>, vector<8x256xf32> -> vector<8x256xf32>
    %c0_3 = arith.constant 0 : index
    %c0_4 = arith.constant 0 : index
    %4 = vector.load %arg5[%c0_3, %c0_4] : memref<8x256xf32, #tpu.memory_space<vmem>>, vector<1x256xf32>
    %5 = vector.broadcast %4 : vector<1x256xf32> to vector<8x256xf32>
    %6 = arith.addf %3, %5 : vector<8x256xf32>
    %cst_5 = arith.constant 0.000000e+00 : f32
    %7 = vector.broadcast %cst_5 : f32 to vector<8x256xf32>
    %8 = arith.maximumf %6, %7 : vector<8x256xf32>
    %c0_6 = arith.constant 0 : index
    %c0_7 = arith.constant 0 : index
    %9 = vector.load %arg2[%c0_6, %c0_7] : memref<256x256xbf16, #tpu.memory_space<vmem>>, vector<256x256xbf16>
    %10 = arith.extf %9 : vector<256x256xbf16> to vector<256x256xf32>
    %cst_8 = arith.constant dense<0.000000e+00> : vector<8x256xf32>
    %11 = tpu.matmul %8, %10, %cst_8 {dimension_numbers = #tpu.dot_dimension_numbers<[1], [0], [0], [1], [0, 0, 1, 1], [], []>} : vector<8x256xf32>, vector<256x256xf32>, vector<8x256xf32> -> vector<8x256xf32>
    %c1 = arith.constant 1 : index
    %c0_9 = arith.constant 0 : index
    %12 = vector.load %arg5[%c1, %c0_9] : memref<8x256xf32, #tpu.memory_space<vmem>>, vector<1x256xf32>
    %13 = vector.broadcast %12 : vector<1x256xf32> to vector<8x256xf32>
    %14 = arith.addf %11, %13 : vector<8x256xf32>
    %cst_10 = arith.constant 0.000000e+00 : f32
    %15 = vector.broadcast %cst_10 : f32 to vector<8x256xf32>
    %16 = arith.maximumf %14, %15 : vector<8x256xf32>
    %c0_11 = arith.constant 0 : index
    %c0_12 = arith.constant 0 : index
    %17 = vector.load %arg3[%c0_11, %c0_12] : memref<256x256xbf16, #tpu.memory_space<vmem>>, vector<256x256xbf16>
    %18 = arith.extf %17 : vector<256x256xbf16> to vector<256x256xf32>
    %cst_13 = arith.constant dense<0.000000e+00> : vector<8x256xf32>
    %19 = tpu.matmul %16, %18, %cst_13 {dimension_numbers = #tpu.dot_dimension_numbers<[1], [0], [0], [1], [0, 0, 1, 1], [], []>} : vector<8x256xf32>, vector<256x256xf32>, vector<8x256xf32> -> vector<8x256xf32>
    %c2 = arith.constant 2 : index
    %c0_14 = arith.constant 0 : index
    %20 = vector.load %arg5[%c2, %c0_14] : memref<8x256xf32, #tpu.memory_space<vmem>>, vector<1x256xf32>
    %21 = vector.broadcast %20 : vector<1x256xf32> to vector<8x256xf32>
    %22 = arith.addf %19, %21 : vector<8x256xf32>
    %cst_15 = arith.constant 0.000000e+00 : f32
    %23 = vector.broadcast %cst_15 : f32 to vector<8x256xf32>
    %24 = arith.maximumf %22, %23 : vector<8x256xf32>
    %c0_16 = arith.constant 0 : index
    %c0_17 = arith.constant 0 : index
    %25 = vector.load %arg4[%c0_16, %c0_17] : memref<256x512xbf16, #tpu.memory_space<vmem>>, vector<256x512xbf16>
    %26 = arith.extf %25 : vector<256x512xbf16> to vector<256x512xf32>
    %cst_18 = arith.constant dense<0.000000e+00> : vector<8x512xf32>
    %27 = tpu.matmul %24, %26, %cst_18 {dimension_numbers = #tpu.dot_dimension_numbers<[1], [0], [0], [1], [0, 0, 1, 1], [], []>} : vector<8x256xf32>, vector<256x512xf32>, vector<8x512xf32> -> vector<8x512xf32>
    %c0_19 = arith.constant 0 : index
    %c0_20 = arith.constant 0 : index
    %28 = vector.load %arg6[%c0_19, %c0_20] : memref<8x512xf32, #tpu.memory_space<vmem>>, vector<1x512xf32>
    %29 = vector.broadcast %28 : vector<1x512xf32> to vector<8x512xf32>
    %30 = arith.addf %27, %29 : vector<8x512xf32>
    %c0_21 = arith.constant 0 : index
    %c0_22 = arith.constant 0 : index
    %31 = vector.load %arg7[%c0_21, %c0_22] : memref<8x512xf32, #tpu.memory_space<vmem>>, vector<8x512xf32>
    tpu.vector_store %arg7[%c0_21, %c0_22], %30 {strides = array<i32>} : memref<8x512xf32, #tpu.memory_space<vmem>>, vector<8x512xf32>,
    return
  }
}

</mosaic_0001>

<bundles_post_ra>
// kernel: tpu_custom_call.1
= control target key start
LH: loop header
LB: loop body
LE: loop exit
PB: predicated region body
PF: predicated region fallthrough
CT: control target
= control target key end

     0   :  { %12 = vsyncpa [#allocation3], 0  ;;  %s2415_s0 = inlined_call_operand.hbm [shape: f32[8,512], index: 0, kind: input, shape index: {}]   ;;  %s2416_s1 = inlined_call_operand.hbm [shape: bf16[512,256], index: 1, kind: input, shape index: {}]   ;;  %s2417_s2 = inlined_call_operand.hbm [shape: bf16[256,256], index: 2, kind: input, shape index: {}]   ;;  %s2418_s3 = inlined_call_operand.hbm [shape: bf16[256,256], index: 3, kind: input, shape index: {}]   ;;  %s2419_s4 = inlined_call_operand.hbm [shape: bf16[256,512], index: 4, kind: input, shape index: {}]   ;;  %s2420_s5 = inlined_call_operand.vmem [shape: f32[8,256], index: 5, kind: input, shape index: {}]   ;;  %s2421_s6 = inlined_call_operand.hbm [shape: f32[8,512], index: 6, kind: input, shape index: {}]   ;;  %s2422_s7 = inlined_call_operand.hbm [shape: f32[8,512], index: 7, kind: output, shape index: {}]  }
   0x1   :  { %13 = vsyncpa [#allocation6], 0 }
   0x2   :  { %14 = vsyncpa [#allocation9], 0 }
   0x3   :  { %15 = vsyncpa [#allocation12], 0 }
   0x4   :  { %16 = vsyncpa [#allocation4], 0  ;;  %s2244_s24 = smov [#allocation5]   ;;  %s2080_s28 = scalar_lea.hbm %s2416_s1, 8192 }
   0x5   :  { %s32_s25 = sshll.u32 %s2244_s24, 4  ;;  %p2081_p0 = scmp.ne.s32.totalorder %s2416_s1, %s2080_s28  ;;  %s33_s25 = int_to_ptr.vmem [resolvable:$true] %s32_s25 }
   0x6   :  { %p2084_p1 = scmp.lt.u32.totalorder %s2080_s28, %s2416_s1 }
   0x8   :  { %p2086_p2 = pnand %p2084_p1, %p2081_p0 }
   0xa   :  { %2089 = shalt.err (!%p2086_p2)
}
   0xb   :  { %s2090_s10 = scalar_lea.vmem %s33_s25, 8192  ;;  %p2095_p4 = scmp.lt.s32.totalorder %s33_s25, %s33_s25 }
   0xc   :  { %p2091_p3 = scmp.ne.s32.totalorder %s33_s25, %s2090_s10  ;;  %p2096_p5 = scmp.lt.s32.totalorder %s2090_s10, %s2090_s10 }
   0xe   :  { %p2097_p6 = por %p2096_p5, %p2095_p4 }
  0x10   :  { %p2098_p7 = pnand %p2097_p6, %p2091_p3 }
  0x12   :  { %2101 = shalt.err (!%p2098_p7)
}
  0x13   :  { %s2245_s11 = smov 128   ;;  %s2246_s12 = smov 8  }
  0x14   :  { %38 = dma.hbm_to_vmem [thread:$0]  %s2416_s1, 8192, %s33_s25, [#allocation6], %s2245_s11, %s2245_s11, %s2246_s12  }
  0x15   :  { %s2247_s15 = smov [#allocation8]   ;;  %s2248_s17 = smov [#allocation2]  }
  0x16   :  { %s56_s16 = sshll.u32 %s2247_s15, 4  ;;  %s23_s18 = sshll.u32 %s2248_s17, 4  ;;  %s57_s16 = int_to_ptr.vmem [resolvable:$true] %s56_s16  ;;  %s24_s18 = int_to_ptr.vmem [resolvable:$true] %s23_s18 }
  0x17   :  { %s2102_s21 = scalar_lea.hbm %s2418_s3, 4096 }
  0x18   :  { %p2103_p8 = scmp.ne.s32.totalorder %s2418_s3, %s2102_s21  ;;  %p2106_p9 = scmp.lt.u32.totalorder %s2102_s21, %s2418_s3 }
  0x1a   :  { %p2108_p10 = pnand %p2106_p9, %p2103_p8 }
  0x1c   :  { %2111 = shalt.err (!%p2108_p10)
}
  0x1d   :  { %s2112_s1 = scalar_lea.vmem %s57_s16, 4096  ;;  %p2117_p12 = scmp.lt.s32.totalorder %s57_s16, %s57_s16 }
  0x1e   :  { %p2113_p11 = scmp.ne.s32.totalorder %s57_s16, %s2112_s1  ;;  %p2118_p13 = scmp.lt.s32.totalorder %s2112_s1, %s2112_s1 }
  0x20   :  { %p2119_p0 = por %p2118_p13, %p2117_p12 }
  0x22   :  { %p2120_p1 = pnand %p2119_p0, %p2113_p11 }
  0x24   :  { %2123 = shalt.err (!%p2120_p1)
}
  0x25   :  { %62 = dma.hbm_to_vmem [thread:$0]  %s2418_s3, 4096, %s57_s16, [#allocation9], %s2245_s11, %s2245_s11, %s2246_s12  }
  0x26   :  { %s2124_s30 = scalar_lea.hbm %s2415_s0, 512 }
  0x27   :  { %p2125_p2 = scmp.ne.s32.totalorder %s2415_s0, %s2124_s30  ;;  %p2128_p3 = scmp.lt.u32.totalorder %s2124_s30, %s2415_s0 }
  0x29   :  { %p2130_p4 = pnand %p2128_p3, %p2125_p2 }
  0x2b   :  { %2133 = shalt.err (!%p2130_p4)
}
  0x2c   :  { %s2134_s14 = scalar_lea.vmem %s24_s18, 512  ;;  %p2139_p6 = scmp.lt.s32.totalorder %s24_s18, %s24_s18 }
  0x2d   :  { %p2135_p5 = scmp.ne.s32.totalorder %s24_s18, %s2134_s14  ;;  %p2140_p7 = scmp.lt.s32.totalorder %s2134_s14, %s2134_s14 }
  0x2f   :  { %p2141_p8 = por %p2140_p7, %p2139_p6 }
  0x31   :  { %p2142_p9 = pnand %p2141_p8, %p2135_p5 }
  0x33   :  { %2145 = shalt.err (!%p2142_p9)
}
  0x34   :  { %26 = dma.hbm_to_vmem [thread:$0]  %s2415_s0, 512, %s24_s18, [#allocation3]  }
  0x35   :  { %s2249_s16 = smov [#allocation7]   ;;  %s2250_s19 = smov [#allocation10]  }
  0x36   :  { %s44_s17 = sshll.u32 %s2249_s16, 4  ;;  %s68_s20 = sshll.u32 %s2250_s19, 4  ;;  %s45_s17 = int_to_ptr.vmem [resolvable:$true] %s44_s17  ;;  %s69_s20 = int_to_ptr.vmem [resolvable:$true] %s68_s20 }
  0x37   :  { %s2146_s23 = scalar_lea.hbm %s2417_s2, 4096 }
  0x38   :  { %p2147_p10 = scmp.ne.s32.totalorder %s2417_s2, %s2146_s23  ;;  %p2150_p11 = scmp.lt.u32.totalorder %s2146_s23, %s2417_s2 }
  0x3a   :  { %p2152_p12 = pnand %p2150_p11, %p2147_p10 }
  0x3c   :  { %2155 = shalt.err (!%p2152_p12)
}
  0x3d   :  { %s2156_s0 = scalar_lea.vmem %s45_s17, 4096  ;;  %p2161_p0 = scmp.lt.s32.totalorder %s45_s17, %s45_s17 }
  0x3e   :  { %p2157_p13 = scmp.ne.s32.totalorder %s45_s17, %s2156_s0  ;;  %p2162_p1 = scmp.lt.s32.totalorder %s2156_s0, %s2156_s0 }
  0x40   :  { %p2163_p2 = por %p2162_p1, %p2161_p0 }
  0x42   :  { %p2164_p3 = pnand %p2163_p2, %p2157_p13 }
  0x44   :  { %2167 = shalt.err (!%p2164_p3)
}
  0x45   :  { %50 = dma.hbm_to_vmem [thread:$0]  %s2417_s2, 4096, %s45_s17, [#allocation6], %s2245_s11, %s2245_s11, %s2246_s12  }
  0x46   :  { %s2168_s30 = scalar_lea.hbm %s2419_s4, 8192 }
  0x47   :  { %p2169_p4 = scmp.ne.s32.totalorder %s2419_s4, %s2168_s30  ;;  %p2172_p5 = scmp.lt.u32.totalorder %s2168_s30, %s2419_s4 }
  0x49   :  { %p2174_p6 = pnand %p2172_p5, %p2169_p4 }
  0x4b   :  { %2177 = shalt.err (!%p2174_p6)
}
  0x4c   :  { %s2178_s14 = scalar_lea.vmem %s69_s20, 8192  ;;  %p2183_p8 = scmp.lt.s32.totalorder %s69_s20, %s69_s20 }
  0x4d   :  { %p2179_p7 = scmp.ne.s32.totalorder %s69_s20, %s2178_s14  ;;  %p2184_p9 = scmp.lt.s32.totalorder %s2178_s14, %s2178_s14 }
  0x4f   :  { %p2185_p10 = por %p2184_p9, %p2183_p8 }
  0x51   :  { %p2186_p11 = pnand %p2185_p10, %p2179_p7 }
  0x53   :  { %2189 = shalt.err (!%p2186_p11)
}
  0x54   :  { %s2251_s2 = smov 256   ;;  %s2252_s11 = smov 16  }
  0x55   :  { %74 = dma.hbm_to_vmem [thread:$0]  %s2419_s4, 8192, %s69_s20, [#allocation9], %s2251_s2, %s2251_s2, %s2252_s11  }
  0x56   :  { %s2253_s15 = smov [#allocation11]   ;;  %s2190_s21 = scalar_lea.hbm %s2421_s6, 512 }
  0x57   :  { %s83_s16 = sshll.u32 %s2253_s15, 4  ;;  %p2191_p12 = scmp.ne.s32.totalorder %s2421_s6, %s2190_s21  ;;  %s84_s16 = int_to_ptr.vmem [resolvable:$true] %s83_s16 }
  0x58   :  { %p2194_p13 = scmp.lt.u32.totalorder %s2190_s21, %s2421_s6 }
  0x5a   :  { %p2196_p0 = pnand %p2194_p13, %p2191_p12 }
  0x5c   :  { %2199 = shalt.err (!%p2196_p0)
}
  0x5d   :  { %s2200_s1 = scalar_lea.vmem %s84_s16, 512  ;;  %p2205_p2 = scmp.lt.s32.totalorder %s84_s16, %s84_s16 }
  0x5e   :  { %p2201_p1 = scmp.ne.s32.totalorder %s84_s16, %s2200_s1  ;;  %p2206_p3 = scmp.lt.s32.totalorder %s2200_s1, %s2200_s1 }
  0x60   :  { %p2207_p4 = por %p2206_p3, %p2205_p2 }
  0x62   :  { %p2208_p5 = pnand %p2207_p4, %p2201_p1 }
  0x64   :  { %2211 = shalt.err (!%p2208_p5)
}
  0x65   :  { %86 = dma.hbm_to_vmem [thread:$0]  %s2421_s6, 512, %s84_s16, [#allocation12]  }
  0x66   :  { %2234 = dma.done.wait [#allocation3], 512  }
  0x67   :  { %2235 = vsyncadd [#allocation3], 4294966784 }
  0x68   :  { %2236 = dma.done.wait [#allocation6], 12288  }
  0x69   :  { %2237 = vsyncadd [#allocation6], 4294955008 }
  0x6a   :  { %2238 = dma.done.wait [#allocation9], 12288  }
  0x6b   :  { %2239 = vsyncadd [#allocation9], 4294955008 }
  0x6c   :  { %2240 = dma.done.wait [#allocation12], 512  }
  0x6d   :  { %2241 = vsyncadd [#allocation12], 4294966784  ;;  %v1792_v0 = vld [vmem:[#allocation5 + $0x4] ss:$8 sps:$4 sm:$0xff]   ;;  %v1794_v1 = vld [vmem:[#allocation5] ss:$8 sps:$4 sm:$0xff]  }
  0x6e   :  { %1202 = vmatprep.subr.bf16.mxu0 %v1792_v0  ;;  %v1795_v2 = vld [vmem:[#allocation5 + $0x14] ss:$8 sps:$4 sm:$0xff]   ;;  %v1797_v3 = vld [vmem:[#allocation5 + $0x10] ss:$8 sps:$4 sm:$0xff]   ;;  %v1798_v4 = vld [vmem:[#allocation5 + $0x24] ss:$8 sps:$4 sm:$0xff]  }
  0x6f   :  { %1204 = vmatpush1.bf16.msra.mxu0 %v1794_v1  ;;  %v1800_v5 = vld [vmem:[#allocation5 + $0x20] ss:$8 sps:$4 sm:$0xff]   ;;  %v1801_v6 = vld [vmem:[#allocation5 + $0x34] ss:$8 sps:$4 sm:$0xff]   ;;  %v1803_v7 = vld [vmem:[#allocation5 + $0x30] ss:$8 sps:$4 sm:$0xff]  }
  0x70   :  { %1206 = vmatprep.subr.bf16.mxu0 %v1795_v2  ;;  %v1804_v8 = vld [vmem:[#allocation5 + $0x44] ss:$8 sps:$4 sm:$0xff]   ;;  %v1806_v9 = vld [vmem:[#allocation5 + $0x40] ss:$8 sps:$4 sm:$0xff]   ;;  %v1807_v10 = vld [vmem:[#allocation5 + $0x54] ss:$8 sps:$4 sm:$0xff]  }
  0x71   :  { %v1809_v11 = vld [vmem:[#allocation5 + $0x50] ss:$8 sps:$4 sm:$0xff]   ;;  %v1810_v12 = vld [vmem:[#allocation5 + $0x64] ss:$8 sps:$4 sm:$0xff]   ;;  %v1812_v14 = vld [vmem:[#allocation5 + $0x60] ss:$8 sps:$4 sm:$0xff]  }
  0x72   :  { %v106_v13 = vld [vmem:[#allocation2 + $0x8] sm:$0xff]  ;;  %v1813_v15 = vld [vmem:[#allocation5 + $0x74] ss:$8 sps:$4 sm:$0xff]   ;;  %v1815_v16 = vld [vmem:[#allocation5 + $0x70] ss:$8 sps:$4 sm:$0xff]  }
  0x73   :  { %1208 = vmatpush1.bf16.msra.mxu0 %v1797_v3  ;;  %377 = vmatprep.mubr.f32.mxu0 %v106_v13  ;;  %v1816_v17 = vld [vmem:[#allocation5 + $0x84] ss:$8 sps:$4 sm:$0xff]   ;;  %v1818_v18 = vld [vmem:[#allocation5 + $0x80] ss:$8 sps:$4 sm:$0xff]   ;;  %v1819_v19 = vld [vmem:[#allocation5 + $0x94] ss:$8 sps:$4 sm:$0xff]  }
  0x74   :  { %1210 = vmatprep.subr.bf16.mxu0 %v1798_v4  ;;  %v1821_v20 = vld [vmem:[#allocation5 + $0x90] ss:$8 sps:$4 sm:$0xff]   ;;  %v1822_v21 = vld [vmem:[#allocation5 + $0xa4] ss:$8 sps:$4 sm:$0xff]   ;;  %v1824_v22 = vld [vmem:[#allocation5 + $0xa0] ss:$8 sps:$4 sm:$0xff]  }
  0x75   :  { %v1825_v23 = vld [vmem:[#allocation5 + $0xb4] ss:$8 sps:$4 sm:$0xff]   ;;  %v1827_v24 = vld [vmem:[#allocation5 + $0xb0] ss:$8 sps:$4 sm:$0xff]   ;;  %v1828_v25 = vld [vmem:[#allocation5 + $0xc4] ss:$8 sps:$4 sm:$0xff]  }
  0x76   :  { %v1888_v26 = vld [vmem:[#allocation7 + $0x4] ss:$8 sps:$4 sm:$0xff]   ;;  %v1890_v27 = vld [vmem:[#allocation7] ss:$8 sps:$4 sm:$0xff]   ;;  %v1891_v29 = vld [vmem:[#allocation7 + $0x14] ss:$8 sps:$4 sm:$0xff]  }
  0x77   :  { %1212 = vmatpush1.bf16.msra.mxu0 %v1800_v5  ;;  %v1830_v28 = vld [vmem:[#allocation5 + $0xc0] ss:$8 sps:$4 sm:$0xff]   ;;  %1330 = vmatprep.subr.bf16.mxu1 %v1888_v26  ;;  %v1831_v30 = vld [vmem:[#allocation5 + $0xd4] ss:$8 sps:$4 sm:$0xff]   ;;  %v1893_v31 = vld [vmem:[#allocation7 + $0x10] ss:$8 sps:$4 sm:$0xff]  }
  0x78   :  { %1214 = vmatprep.subr.bf16.mxu0 %v1801_v6  ;;  %1332 = vmatpush1.bf16.msra.mxu1 %v1890_v27  ;;  %v1894_v32 = vld [vmem:[#allocation7 + $0x24] ss:$8 sps:$4 sm:$0xff]   ;;  %v1833_v33 = vld [vmem:[#allocation5 + $0xd0] ss:$8 sps:$4 sm:$0xff]   ;;  %v1896_v35 = vld [vmem:[#allocation7 + $0x20] ss:$8 sps:$4 sm:$0xff]  }
  0x79   :  { %1334 = vmatprep.subr.bf16.mxu1 %v1891_v29  ;;  %v1834_v34 = vld [vmem:[#allocation5 + $0xe4] ss:$8 sps:$4 sm:$0xff]   ;;  %v1897_v36 = vld [vmem:[#allocation7 + $0x34] ss:$8 sps:$4 sm:$0xff]   ;;  %v1836_v37 = vld [vmem:[#allocation5 + $0xe0] ss:$8 sps:$4 sm:$0xff]  }
  0x7a   :  { %v1837_v38 = vld [vmem:[#allocation5 + $0xf4] ss:$8 sps:$4 sm:$0xff]   ;;  %v1899_v39 = vld [vmem:[#allocation7 + $0x30] ss:$8 sps:$4 sm:$0xff]   ;;  %v1900_v40 = vld [vmem:[#allocation7 + $0x44] ss:$8 sps:$4 sm:$0xff]  }
  0x7b   :  { %1216 = vmatpush1.bf16.msra.mxu0 %v1803_v7  ;;  %v1839_v41 = vld [vmem:[#allocation5 + $0xf0] ss:$8 sps:$4 sm:$0xff]   ;;  %v1840_v42 = vld [vmem:[#allocation5 + $0x104] ss:$8 sps:$4 sm:$0xff]   ;;  %v1902_v43 = vld [vmem:[#allocation7 + $0x40] ss:$8 sps:$4 sm:$0xff]  }
  0x7c   :  { %1218 = vmatprep.subr.bf16.mxu0 %v1804_v8  ;;  %1336 = vmatpush1.bf16.msra.mxu1 %v1893_v31  ;;  %v1903_v44 = vld [vmem:[#allocation7 + $0x54] ss:$8 sps:$4 sm:$0xff]   ;;  %v1842_v45 = vld [vmem:[#allocation5 + $0x100] ss:$8 sps:$4 sm:$0xff]   ;;  %v1905_v49 = vld [vmem:[#allocation7 + $0x50] ss:$8 sps:$4 sm:$0xff]  }
  0x7d   :  { %1338 = vmatprep.subr.bf16.mxu1 %v1894_v32  ;;  %v105_v46 = vld [vmem:[#allocation2] sm:$0xff]  ;;  %v1843_v47 = vld [vmem:[#allocation5 + $0x114] ss:$8 sps:$4 sm:$0xff]   ;;  %v1845_v51 = vld [vmem:[#allocation5 + $0x110] ss:$8 sps:$4 sm:$0xff]  }
  0x7e   :  { %v108_v48 = vld [vmem:[#allocation2 + $0x18] sm:$0xff]  ;;  %v1906_v50 = vld [vmem:[#allocation7 + $0x64] ss:$8 sps:$4 sm:$0xff]   ;;  %v1908_v53 = vld [vmem:[#allocation7 + $0x60] ss:$8 sps:$4 sm:$0xff]  }
  0x7f   :  { %1220 = vmatpush1.bf16.msra.mxu0 %v1806_v9  ;;  %v1846_v52 = vld [vmem:[#allocation5 + $0x124] ss:$8 sps:$4 sm:$0xff]   ;;  %v1909_v54 = vld [vmem:[#allocation7 + $0x74] ss:$8 sps:$4 sm:$0xff]   ;;  %v1848_v55 = vld [vmem:[#allocation5 + $0x120] ss:$8 sps:$4 sm:$0xff]  }
  0x80   :  { %1222 = vmatprep.subr.bf16.mxu0 %v1807_v10  ;;  %1340 = vmatpush1.bf16.msra.mxu1 %v1896_v35  ;;  %v1849_v56 = vld [vmem:[#allocation5 + $0x134] ss:$8 sps:$4 sm:$0xff]   ;;  %v1911_v57 = vld [vmem:[#allocation7 + $0x70] ss:$8 sps:$4 sm:$0xff]   ;;  %v1912_v58 = vld [vmem:[#allocation7 + $0x84] ss:$8 sps:$4 sm:$0xff]  }
  0x81   :  { %1342 = vmatprep.subr.bf16.mxu1 %v1897_v36  ;;  %v1851_v59 = vld [vmem:[#allocation5 + $0x130] ss:$8 sps:$4 sm:$0xff]   ;;  %v1852_v60 = vld [vmem:[#allocation5 + $0x144] ss:$8 sps:$4 sm:$0xff]   ;;  %v1914_v61 = vld [vmem:[#allocation7 + $0x80] ss:$8 sps:$4 sm:$0xff]  }
  0x82   :  { %v1915_v62 = vld [vmem:[#allocation7 + $0x94] ss:$8 sps:$4 sm:$0xff]   ;;  %v1854_v63 = vld [vmem:[#allocation5 + $0x140] ss:$8 sps:$4 sm:$0xff]   ;;  %v1917_v1 = vld [vmem:[#allocation7 + $0x90] ss:$8 sps:$4 sm:$0xff]  }
  0x83   :  { %1224 = vmatpush1.bf16.msra.mxu0 %v1809_v11  ;;  %v1855_v0 = vld [vmem:[#allocation5 + $0x154] ss:$8 sps:$4 sm:$0xff]   ;;  %v1918_v2 = vld [vmem:[#allocation7 + $0xa4] ss:$8 sps:$4 sm:$0xff]   ;;  %v1857_v3 = vld [vmem:[#allocation5 + $0x150] ss:$8 sps:$4 sm:$0xff]  }
  0x84   :  { %1226 = vmatprep.subr.bf16.mxu0 %v1810_v12  ;;  %1344 = vmatpush1.bf16.msra.mxu1 %v1899_v39  ;;  %v1858_v4 = vld [vmem:[#allocation5 + $0x164] ss:$8 sps:$4 sm:$0xff]   ;;  %v1920_v5 = vld [vmem:[#allocation7 + $0xa0] ss:$8 sps:$4 sm:$0xff]   ;;  %v1921_v6 = vld [vmem:[#allocation7 + $0xb4] ss:$8 sps:$4 sm:$0xff]  }
  0x85   :  { %1346 = vmatprep.subr.bf16.mxu1 %v1900_v40  ;;  %v1860_v7 = vld [vmem:[#allocation5 + $0x160] ss:$8 sps:$4 sm:$0xff]   ;;  %v1861_v8 = vld [vmem:[#allocation5 + $0x174] ss:$8 sps:$4 sm:$0xff]   ;;  %v1923_v9 = vld [vmem:[#allocation7 + $0xb0] ss:$8 sps:$4 sm:$0xff]  }
  0x86   :  { %v1924_v10 = vld [vmem:[#allocation7 + $0xc4] ss:$8 sps:$4 sm:$0xff]   ;;  %v1863_v11 = vld [vmem:[#allocation5 + $0x170] ss:$8 sps:$4 sm:$0xff]   ;;  %v1926_v13 = vld [vmem:[#allocation7 + $0xc0] ss:$8 sps:$4 sm:$0xff]  }
  0x87   :  { %1228 = vmatpush1.bf16.msra.mxu0 %v1812_v14  ;;  %v1864_v12 = vld [vmem:[#allocation5 + $0x184] ss:$8 sps:$4 sm:$0xff]   ;;  %v1927_v14 = vld [vmem:[#allocation7 + $0xd4] ss:$8 sps:$4 sm:$0xff]   ;;  %v1881_v27 = vld [vmem:[#allocation5 + $0x1d0] ss:$8 sps:$4 sm:$0xff]  }
  0x88   :  { %1230 = vmatprep.subr.bf16.mxu0 %v1813_v15  ;;  %1348 = vmatpush1.bf16.msra.mxu1 %v1902_v43  ;;  %v1866_v15 = vld [vmem:[#allocation5 + $0x180] ss:$8 sps:$4 sm:$0xff]   ;;  %v1879_v26 = vld [vmem:[#allocation5 + $0x1d4] ss:$8 sps:$4 sm:$0xff]   ;;  %v1887_v31 = vld [vmem:[#allocation5 + $0x1f0] ss:$8 sps:$4 sm:$0xff]  }
  0x89   :  { %1350 = vmatprep.subr.bf16.mxu1 %v1903_v44  ;;  %v1884_v29 = vld [vmem:[#allocation5 + $0x1e0] ss:$8 sps:$4 sm:$0xff]   ;;  %v107_v32 = vld [vmem:[#allocation2 + $0x10] sm:$0xff]  ;;  %v1936_v36 = vld [vmem:[#allocation8 + $0x4] ss:$8 sps:$4 sm:$0xff]  }
  0x8a   :  { %v1935_v35 = vld [vmem:[#allocation7 + $0xf0] ss:$8 sps:$4 sm:$0xff]   ;;  %v301_v40 = vld [vmem:[%s2420_s5] ss:$8 sm:$0x3] }
  0x8b   :  { %1232 = vmatpush1.bf16.msra.mxu0 %v1815_v16  ;;  %v1867_v16 = vld [vmem:[#allocation5 + $0x194] ss:$8 sps:$4 sm:$0xff]  }
  0x8c   :  { %1234 = vmatprep.subr.bf16.mxu0 %v1816_v17  ;;  %1352 = vmatpush1.bf16.msra.mxu1 %v1905_v49  ;;  %v1929_v17 = vld [vmem:[#allocation7 + $0xd0] ss:$8 sps:$4 sm:$0xff]   ;;  %v1938_v49 = vld [vmem:[#allocation8] ss:$8 sps:$4 sm:$0xff]  }
  0x8d   :  { %1354 = vmatprep.subr.bf16.mxu1 %v1906_v50 }
  0x8f   :  { %1236 = vmatpush1.bf16.msra.mxu0 %v1818_v18  ;;  %v1930_v18 = vld [vmem:[#allocation7 + $0xe4] ss:$8 sps:$4 sm:$0xff]  }
  0x90   :  { %1238 = vmatprep.subr.bf16.mxu0 %v1819_v19  ;;  %1356 = vmatpush1.bf16.msra.mxu1 %v1908_v53  ;;  %v1869_v19 = vld [vmem:[#allocation5 + $0x190] ss:$8 sps:$4 sm:$0xff]   ;;  %v1942_v53 = vld [vmem:[#allocation8 + $0x24] ss:$8 sps:$4 sm:$0xff]  }
  0x91   :  { %1358 = vmatprep.subr.bf16.mxu1 %v1909_v54  ;;  %v1944_v54 = vld [vmem:[#allocation8 + $0x20] ss:$8 sps:$4 sm:$0xff]  }
  0x93   :  { %1240 = vmatpush1.bf16.msra.mxu0 %v1821_v20  ;;  %v1870_v20 = vld [vmem:[#allocation5 + $0x1a4] ss:$8 sps:$4 sm:$0xff]  }
  0x94   :  { %1242 = vmatprep.subr.bf16.mxu0 %v1822_v21  ;;  %1360 = vmatpush1.bf16.msra.mxu1 %v1911_v57  ;;  %v1872_v21 = vld [vmem:[#allocation5 + $0x1a0] ss:$8 sps:$4 sm:$0xff]   ;;  %v1948_v57 = vld [vmem:[#allocation8 + $0x44] ss:$8 sps:$4 sm:$0xff]  }
  0x95   :  { %1362 = vmatprep.subr.bf16.mxu1 %v1912_v58  ;;  %v1950_v58 = vld [vmem:[#allocation8 + $0x40] ss:$8 sps:$4 sm:$0xff]  }
  0x97   :  { %1244 = vmatpush1.bf16.msra.mxu0 %v1824_v22  ;;  %v1873_v22 = vld [vmem:[#allocation5 + $0x1b4] ss:$8 sps:$4 sm:$0xff]  }
  0x98   :  { %1246 = vmatprep.subr.bf16.mxu0 %v1825_v23  ;;  %1364 = vmatpush1.bf16.msra.mxu1 %v1914_v61  ;;  %v1875_v23 = vld [vmem:[#allocation5 + $0x1b0] ss:$8 sps:$4 sm:$0xff]   ;;  %v1954_v61 = vld [vmem:[#allocation8 + $0x64] ss:$8 sps:$4 sm:$0xff]  }
  0x99   :  { %1366 = vmatprep.subr.bf16.mxu1 %v1915_v62  ;;  %v1956_v62 = vld [vmem:[#allocation8 + $0x60] ss:$8 sps:$4 sm:$0xff]  }
  0x9b   :  { %1248 = vmatpush1.bf16.msra.mxu0 %v1827_v24  ;;  %v1876_v24 = vld [vmem:[#allocation5 + $0x1c4] ss:$8 sps:$4 sm:$0xff]  }
  0x9c   :  { %1250 = vmatprep.subr.bf16.mxu0 %v1828_v25  ;;  %1368 = vmatpush1.bf16.msra.mxu1 %v1917_v1  ;;  %v1878_v25 = vld [vmem:[#allocation5 + $0x1c0] ss:$8 sps:$4 sm:$0xff]   ;;  %v1960_v1 = vld [vmem:[#allocation8 + $0x84] ss:$8 sps:$4 sm:$0xff]  }
  0x9d   :  { %1370 = vmatprep.subr.bf16.mxu1 %v1918_v2  ;;  %v1962_v2 = vld [vmem:[#allocation8 + $0x80] ss:$8 sps:$4 sm:$0xff]  }
  0x9f   :  { %1252 = vmatpush1.bf16.msra.mxu0 %v1830_v28  ;;  %v1882_v28 = vld [vmem:[#allocation5 + $0x1e4] ss:$8 sps:$4 sm:$0xff]  }
  0xa0   :  { %1254 = vmatprep.subr.bf16.mxu0 %v1831_v30  ;;  %1372 = vmatpush1.bf16.msra.mxu1 %v1920_v5  ;;  %v1885_v30 = vld [vmem:[#allocation5 + $0x1f4] ss:$8 sps:$4 sm:$0xff]   ;;  %v1966_v5 = vld [vmem:[#allocation8 + $0xa4] ss:$8 sps:$4 sm:$0xff]  }
  0xa1   :  { %1374 = vmatprep.subr.bf16.mxu1 %v1921_v6  ;;  %v1968_v6 = vld [vmem:[#allocation8 + $0xa0] ss:$8 sps:$4 sm:$0xff]  }
  0xa3   :  { %1256 = vmatpush1.bf16.msra.mxu0 %v1833_v33  ;;  %v1932_v33 = vld [vmem:[#allocation7 + $0xe0] ss:$8 sps:$4 sm:$0xff]  }
  0xa4   :  { %1258 = vmatprep.subr.bf16.mxu0 %v1834_v34  ;;  %1376 = vmatpush1.bf16.msra.mxu1 %v1923_v9  ;;  %v1933_v34 = vld [vmem:[#allocation7 + $0xf4] ss:$8 sps:$4 sm:$0xff]   ;;  %v1972_v9 = vld [vmem:[#allocation8 + $0xc4] ss:$8 sps:$4 sm:$0xff]  }
  0xa5   :  { %1378 = vmatprep.subr.bf16.mxu1 %v1924_v10  ;;  %v1974_v10 = vld [vmem:[#allocation8 + $0xc0] ss:$8 sps:$4 sm:$0xff]  }
  0xa7   :  { %1260 = vmatpush1.bf16.msra.mxu0 %v1836_v37  ;;  %v303_v37 = vlaneseq }
  0xa8   :  { %1262 = vmatprep.subr.bf16.mxu0 %v1837_v38  ;;  %1380 = vmatpush1.bf16.msra.mxu1 %v1926_v13  ;;  %v1978_v13 = vld [vmem:[#allocation8 + $0xe4] ss:$8 sps:$4 sm:$0xff]  }
  0xa9   :  { %1382 = vmatprep.subr.bf16.mxu1 %v1927_v14  ;;  %v2376_v38 = vshrl.u32 %v303_v37, 7  ;;  %v1980_v14 = vld [vmem:[#allocation8 + $0xe0] ss:$8 sps:$4 sm:$0xff]  }
  0xaa   :  { %v2040_v37 = vld [vmem:[#allocation10 + $0x120] ss:$16 sps:$4 sm:$0xff]  }
  0xab   :  { %1264 = vmatpush1.bf16.msra.mxu0 %v1839_v41  ;;  %v2379_v39 = vsub.s32 0, %v2376_v38  ;;  %v2385_v41 = vsub.s32 1, %v2376_v38 }
  0xac   :  { %1266 = vmatprep.subr.bf16.mxu0 %v1840_v42  ;;  %1384 = vmatpush1.bf16.msra.mxu1 %v1929_v17  ;;  %v1984_v17 = vld [vmem:[#allocation10 + $0x4] ss:$16 sps:$4 sm:$0xff]  }
  0xad   :  { %1386 = vmatprep.subr.bf16.mxu1 %v1930_v18  ;;  %v306_v42 = vrot.slane %v301_v40, %v2379_v39  ;;  %v310_v43 = vrot.slane %v301_v40, %v2385_v41  ;;  %v1986_v18 = vld [vmem:[#allocation10] ss:$16 sps:$4 sm:$0xff]   ;;  %v2044_v40 = vld [vmem:[#allocation10 + $0x144] ss:$16 sps:$4 sm:$0xff]  }
  0xae   :  { %378 = vmatmul.mubr.f32.vlgmr.msra.gmra.mrb[0].mxu0 %v105_v46 }
  0xaf   :  { %1268 = vmatpush1.bf16.msra.mxu0 %v1842_v45  ;;  %448 = vmatprep.mubr.f32.mxu0 %v108_v48 }
  0xb0   :  { %1270 = vmatprep.subr.bf16.mxu0 %v1843_v47  ;;  %1388 = vmatpush1.bf16.msra.mxu1 %v1932_v33  ;;  %v2028_v33 = vld [vmem:[#allocation10 + $0xe0] ss:$16 sps:$4 sm:$0xff]  }
  0xb1   :  { %1390 = vmatprep.subr.bf16.mxu1 %v1933_v34  ;;  %v2032_v34 = vld [vmem:[#allocation10 + $0x104] ss:$16 sps:$4 sm:$0xff]  }
  0xb3   :  { %1272 = vmatpush1.bf16.msra.mxu0 %v1845_v51  ;;  %v1939_v51 = vld [vmem:[#allocation8 + $0x14] ss:$8 sps:$4 sm:$0xff]  }
  0xb4   :  { %1274 = vmatprep.subr.bf16.mxu0 %v1846_v52  ;;  %1392 = vmatpush1.bf16.msra.mxu1 %v1935_v35  ;;  %v1941_v52 = vld [vmem:[#allocation8 + $0x10] ss:$8 sps:$4 sm:$0xff]  }
  0xb5   :  { %1394 = vmatprep.subr.bf16.mxu1 %v1936_v36  ;;  %v2034_v35 = vld [vmem:[#allocation10 + $0x100] ss:$16 sps:$4 sm:$0xff]   ;;  %v2038_v36 = vld [vmem:[#allocation10 + $0x124] ss:$16 sps:$4 sm:$0xff]  }
  0xb7   :  { %1276 = vmatpush1.bf16.msra.mxu0 %v1848_v55  ;;  %v1945_v55 = vld [vmem:[#allocation8 + $0x34] ss:$8 sps:$4 sm:$0xff]  }
  0xb8   :  { %1278 = vmatprep.subr.bf16.mxu0 %v1849_v56  ;;  %v1947_v56 = vld [vmem:[#allocation8 + $0x30] ss:$8 sps:$4 sm:$0xff]  }
  0xbb   :  { %1280 = vmatpush1.bf16.msra.mxu0 %v1851_v59  ;;  %v1951_v59 = vld [vmem:[#allocation8 + $0x54] ss:$8 sps:$4 sm:$0xff]  }
  0xbc   :  { %1282 = vmatprep.subr.bf16.mxu0 %v1852_v60  ;;  %v1953_v60 = vld [vmem:[#allocation8 + $0x50] ss:$8 sps:$4 sm:$0xff]  }
  0xbf   :  { %1284 = vmatpush1.bf16.msra.mxu0 %v1854_v63  ;;  %v1957_v63 = vld [vmem:[#allocation8 + $0x74] ss:$8 sps:$4 sm:$0xff]  }
  0xc0   :  { %1286 = vmatprep.subr.bf16.mxu0 %v1855_v0  ;;  %v1959_v0 = vld [vmem:[#allocation8 + $0x70] ss:$8 sps:$4 sm:$0xff]  }
  0xc3   :  { %1288 = vmatpush1.bf16.msra.mxu0 %v1857_v3  ;;  %v1963_v3 = vld [vmem:[#allocation8 + $0x94] ss:$8 sps:$4 sm:$0xff]  }
  0xc4   :  { %1290 = vmatprep.subr.bf16.mxu0 %v1858_v4  ;;  %v1965_v4 = vld [vmem:[#allocation8 + $0x90] ss:$8 sps:$4 sm:$0xff]  }
  0xc7   :  { %1292 = vmatpush1.bf16.msra.mxu0 %v1860_v7  ;;  %v1969_v7 = vld [vmem:[#allocation8 + $0xb4] ss:$8 sps:$4 sm:$0xff]  }
  0xc8   :  { %1294 = vmatprep.subr.bf16.mxu0 %v1861_v8  ;;  %v1971_v8 = vld [vmem:[#allocation8 + $0xb0] ss:$8 sps:$4 sm:$0xff]  }
  0xcb   :  { %1296 = vmatpush1.bf16.msra.mxu0 %v1863_v11  ;;  %v1975_v11 = vld [vmem:[#allocation8 + $0xd4] ss:$8 sps:$4 sm:$0xff]  }
  0xcc   :  { %1298 = vmatprep.subr.bf16.mxu0 %v1864_v12  ;;  %v1977_v12 = vld [vmem:[#allocation8 + $0xd0] ss:$8 sps:$4 sm:$0xff]  }
  0xcf   :  { %1300 = vmatpush1.bf16.msra.mxu0 %v1866_v15  ;;  %v1981_v15 = vld [vmem:[#allocation8 + $0xf4] ss:$8 sps:$4 sm:$0xff]  }
  0xd0   :  { %1302 = vmatprep.subr.bf16.mxu0 %v1867_v16  ;;  %v1983_v16 = vld [vmem:[#allocation8 + $0xf0] ss:$8 sps:$4 sm:$0xff]  }
  0xd3   :  { %1304 = vmatpush1.bf16.msra.mxu0 %v1869_v19  ;;  %v1987_v19 = vld [vmem:[#allocation10 + $0xc] ss:$16 sps:$4 sm:$0xff]  }
  0xd4   :  { %1306 = vmatprep.subr.bf16.mxu0 %v1870_v20  ;;  %v1990_v20 = vld [vmem:[#allocation10 + $0x24] ss:$16 sps:$4 sm:$0xff]  }
  0xd7   :  { %1308 = vmatpush1.bf16.msra.mxu0 %v1872_v21  ;;  %v1992_v21 = vld [vmem:[#allocation10 + $0x20] ss:$16 sps:$4 sm:$0xff]  }
  0xd8   :  { %1310 = vmatprep.subr.bf16.mxu0 %v1873_v22  ;;  %v1996_v22 = vld [vmem:[#allocation10 + $0x44] ss:$16 sps:$4 sm:$0xff]  }
  0xdb   :  { %1312 = vmatpush1.bf16.msra.mxu0 %v1875_v23  ;;  %v1998_v23 = vld [vmem:[#allocation10 + $0x40] ss:$16 sps:$4 sm:$0xff]  }
  0xdc   :  { %1314 = vmatprep.subr.bf16.mxu0 %v1876_v24  ;;  %v2002_v24 = vld [vmem:[#allocation10 + $0x64] ss:$16 sps:$4 sm:$0xff]  }
  0xdf   :  { %1316 = vmatpush1.bf16.msra.mxu0 %v1878_v25  ;;  %v2004_v25 = vld [vmem:[#allocation10 + $0x60] ss:$16 sps:$4 sm:$0xff]  }
  0xe0   :  { %1318 = vmatprep.subr.bf16.mxu0 %v1879_v26  ;;  %v2008_v26 = vld [vmem:[#allocation10 + $0x84] ss:$16 sps:$4 sm:$0xff]  }
  0xe3   :  { %1320 = vmatpush1.bf16.msra.mxu0 %v1881_v27  ;;  %v2010_v27 = vld [vmem:[#allocation10 + $0x80] ss:$16 sps:$4 sm:$0xff]  }
  0xe4   :  { %1322 = vmatprep.subr.bf16.mxu0 %v1882_v28  ;;  %v2014_v28 = vld [vmem:[#allocation10 + $0xa4] ss:$16 sps:$4 sm:$0xff]  }
  0xe7   :  { %1324 = vmatpush1.bf16.msra.mxu0 %v1884_v29  ;;  %v2016_v29 = vld [vmem:[#allocation10 + $0xa0] ss:$16 sps:$4 sm:$0xff]  }
  0xe8   :  { %1326 = vmatprep.subr.bf16.mxu0 %v1885_v30  ;;  %v2020_v30 = vld [vmem:[#allocation10 + $0xc4] ss:$16 sps:$4 sm:$0xff]  }
  0xeb   :  { %1328 = vmatpush1.bf16.msra.mxu0 %v1887_v31  ;;  %v2022_v31 = vld [vmem:[#allocation10 + $0xc0] ss:$16 sps:$4 sm:$0xff]  }
  0xec   :  { %1458 = vmatprep.subr.bf16.mxu0 %v1984_v17  ;;  %v2053_v17 = vld [vmem:[#allocation10 + $0x16c] ss:$16 sps:$4 sm:$0xff]  }
  0xee   :  { %449 = vmatmul.mubr.f32.vlgmr.msra.gmra.mrb[0].mxu0 %v107_v32  ;;  %v2026_v32 = vld [vmem:[#allocation10 + $0xe4] ss:$16 sps:$4 sm:$0xff]  }
  0xef   :  { %1460 = vmatpush1.bf16.msra.mxu0 %v1986_v18  ;;  %v2055_v18 = vld [vmem:[#allocation10 + $0x168] ss:$16 sps:$4 sm:$0xff]  }
  0xf0   :  { %1462 = vmatprep.subr.bf16.mxu0 %v1990_v20  ;;  %v2061_v20 = vld [vmem:[#allocation10 + $0x188] ss:$16 sps:$4 sm:$0xff]  }
  0xf3   :  { %1464 = vmatpush1.bf16.msra.mxu0 %v1992_v21  ;;  %v2065_v21 = vld [vmem:[#allocation10 + $0x1ac] ss:$16 sps:$4 sm:$0xff]  }
  0xf4   :  { %1466 = vmatprep.subr.bf16.mxu0 %v1996_v22  ;;  %v2067_v22 = vld [vmem:[#allocation10 + $0x1a8] ss:$16 sps:$4 sm:$0xff]  }
  0xf7   :  { %1468 = vmatpush1.bf16.msra.mxu0 %v1998_v23  ;;  %v2071_v23 = vld [vmem:[#allocation10 + $0x1cc] ss:$16 sps:$4 sm:$0xff]  }
  0xf8   :  { %1470 = vmatprep.subr.bf16.mxu0 %v2002_v24  ;;  %v2073_v24 = vld [vmem:[#allocation10 + $0x1c8] ss:$16 sps:$4 sm:$0xff]  }
  0xfb   :  { %1472 = vmatpush1.bf16.msra.mxu0 %v2004_v25  ;;  %v2074_v25 = vld [vmem:[#allocation10 + $0x1e4] ss:$16 sps:$4 sm:$0xff]  }
  0xfc   :  { %1474 = vmatprep.subr.bf16.mxu0 %v2008_v26  ;;  %v2077_v26 = vld [vmem:[#allocation10 + $0x1ec] ss:$16 sps:$4 sm:$0xff]  }
  0xff   :  { %1476 = vmatpush1.bf16.msra.mxu0 %v2010_v27  ;;  %v2076_v27 = vld [vmem:[#allocation10 + $0x1e0] ss:$16 sps:$4 sm:$0xff]  }
 0x100   :  { %1478 = vmatprep.subr.bf16.mxu0 %v2014_v28  ;;  %v2079_v28 = vld [vmem:[#allocation10 + $0x1e8] ss:$16 sps:$4 sm:$0xff]  }
 0x103   :  { %1480 = vmatpush1.bf16.msra.mxu0 %v2016_v29  ;;  %v1200_v29 = vld [vmem:[%s2420_s5 + $0x2] ss:$8 sm:$0x3] }
 0x104   :  { %1482 = vmatprep.subr.bf16.mxu0 %v2020_v30  ;;  %v741_v30 = vrot.slane %v1200_v29, %v2379_v39 }
 0x107   :  { %1484 = vmatpush1.bf16.msra.mxu0 %v2022_v31  ;;  %v745_v31 = vrot.slane %v1200_v29, %v2385_v41 }
 0x108   :  { %1486 = vmatprep.subr.bf16.mxu0 %v2026_v32 }
 0x10b   :  { %1488 = vmatpush1.bf16.msra.mxu0 %v2028_v33 }
 0x10c   :  { %1490 = vmatprep.subr.bf16.mxu0 %v2032_v34 }
 0x10f   :  { %1492 = vmatpush1.bf16.msra.mxu0 %v2034_v35 }
 0x110   :  { %1494 = vmatprep.subr.bf16.mxu0 %v2038_v36 }
 0x113   :  { %1496 = vmatpush1.bf16.msra.mxu0 %v2040_v37 }
 0x114   :  { %1498 = vmatprep.subr.bf16.mxu0 %v2044_v40  ;;  %v1025_v40 = vsub.s32 2, %v2376_v38 }
 0x1c1   :  { %v450_v44 = vpop.f32.mrb[0].mxu0 }
 0x1c2   :  { %v1585_v45 = vadd.f32 %v450_v44, %v306_v42  ;;  %v452_v46 = vpop.f32.mrb[1].mxu0  ;;  %v2046_v42 = vld [vmem:[#allocation10 + $0x140] ss:$16 sps:$4 sm:$0xff]  }
 0x1c3   :  { %v1586_v47 = vadd.f32 %v452_v46, %v310_v43  ;;  %v2050_v43 = vld [vmem:[#allocation10 + $0x164] ss:$16 sps:$4 sm:$0xff]   ;;  %1500 = vmatpush1.bf16.msra.mxu0 %v2046_v42  ;;  %v2052_v44 = vld [vmem:[#allocation10 + $0x160] ss:$16 sps:$4 sm:$0xff]  }
 0x1c4   :  { %v455_v50 = vmax.f32 %v1585_v45, 0.0  ;;  %1502 = vmatprep.subr.bf16.mxu0 %v2050_v43  ;;  %v2056_v45 = vld [vmem:[#allocation10 + $0x184] ss:$16 sps:$4 sm:$0xff]   ;;  %v2058_v46 = vld [vmem:[#allocation10 + $0x180] ss:$16 sps:$4 sm:$0xff]   ;;  %v1029_v43 = vsub.s32 3, %v2376_v38 }
 0x1c5   :  { %v456_v48 = vmax.f32 %v1586_v47, 0.0  ;;  %v2062_v47 = vld [vmem:[#allocation10 + $0x1a4] ss:$16 sps:$4 sm:$0xff]   ;;  %v1013_v42 = vld [vmem:[#allocation11] ss:$8 sm:$0xf] }
 0x1c7   :  { %630 = vmatprep.mubr.f32.mxu1 %v456_v48  ;;  %1504 = vmatpush1.bf16.msra.mxu0 %v2052_v44  ;;  %v2064_v48 = vld [vmem:[#allocation10 + $0x1a0] ss:$16 sps:$4 sm:$0xff]   ;;  %v1018_v44 = vrot.slane %v1013_v42, %v2379_v39 }
 0x1c8   :  { %631 = vmatmul.mubr.f32.vlgmr.msra.gmra.mrb[0].mxu1 %v455_v50  ;;  %1506 = vmatprep.subr.bf16.mxu0 %v2056_v45  ;;  %v2070_v50 = vld [vmem:[#allocation10 + $0x1c0] ss:$16 sps:$4 sm:$0xff]   ;;  %v1026_v45 = vrot.slane %v1013_v42, %v1025_v40 }
 0x1c9   :  { %1396 = vmatpush1.bf16.msra.mxu1 %v1938_v49  ;;  %v2068_v49 = vld [vmem:[#allocation10 + $0x1c4] ss:$16 sps:$4 sm:$0xff]  }
 0x1ca   :  { %1398 = vmatprep.subr.bf16.mxu1 %v1939_v51  ;;  %v1199_v51 = vld [vmem:[%s2420_s5 + $0x1] ss:$8 sm:$0x3]  ;;  %s2254_s5 = smov [#allocation13]  }
 0x1cb   :  { %1508 = vmatpush1.bf16.msra.mxu0 %v2058_v46  ;;  %v1022_v46 = vrot.slane %v1013_v42, %v2385_v41  ;;  %s1187_s29 = sshll.u32 %s2254_s5, 4  ;;  %s1188_s29 = int_to_ptr.vmem [resolvable:$true] %s1187_s29 }
 0x1cc   :  { %1510 = vmatprep.subr.bf16.mxu0 %v2062_v47  ;;  %v1030_v47 = vrot.slane %v1013_v42, %v1029_v43  ;;  %s2212_s30 = scalar_lea.vmem %s1188_s29, 512  ;;  %p2217_p7 = scmp.lt.s32.totalorder %s1188_s29, %s1188_s29 }
 0x1cd   :  { %1400 = vmatpush1.bf16.msra.mxu1 %v1941_v52  ;;  %v559_v52 = vrot.slane %v1199_v51, %v2379_v39  ;;  %p2213_p6 = scmp.ne.s32.totalorder %s1188_s29, %s2212_s30  ;;  %p2218_p8 = scmp.lt.s32.totalorder %s2212_s30, %s2212_s30 }
 0x1ce   :  { %1402 = vmatprep.subr.bf16.mxu1 %v1942_v53  ;;  %v563_v53 = vrot.slane %v1199_v51, %v2385_v41 }
 0x1cf   :  { %1512 = vmatpush1.bf16.msra.mxu0 %v2064_v48  ;;  %p2219_p9 = por %p2218_p8, %p2217_p7 }
 0x1d0   :  { %1514 = vmatprep.subr.bf16.mxu0 %v2068_v49 }
 0x1d1   :  { %1404 = vmatpush1.bf16.msra.mxu1 %v1944_v54  ;;  %p2220_p10 = pnand %p2219_p9, %p2213_p6 }
 0x1d2   :  { %1406 = vmatprep.subr.bf16.mxu1 %v1945_v55 }
 0x1d3   :  { %1516 = vmatpush1.bf16.msra.mxu0 %v2070_v50 }
 0x1d4   :  { %1518 = vmatprep.subr.bf16.mxu0 %v2074_v25 }
 0x1d5   :  { %1408 = vmatpush1.bf16.msra.mxu1 %v1947_v56 }
 0x1d6   :  { %1410 = vmatprep.subr.bf16.mxu1 %v1948_v57 }
 0x1d7   :  { %1520 = vmatpush1.bf16.msra.mxu0 %v2076_v27 }
 0x1d9   :  { %1412 = vmatpush1.bf16.msra.mxu1 %v1950_v58 }
 0x1da   :  { %1414 = vmatprep.subr.bf16.mxu1 %v1951_v59  ;;  %v1989_v59 = vld [vmem:[#allocation10 + $0x8] ss:$16 sps:$4 sm:$0xff]  }
 0x1dd   :  { %1416 = vmatpush1.bf16.msra.mxu1 %v1953_v60 }
 0x1de   :  { %1418 = vmatprep.subr.bf16.mxu1 %v1954_v61  ;;  %v1993_v61 = vld [vmem:[#allocation10 + $0x2c] ss:$16 sps:$4 sm:$0xff]  }
 0x1e1   :  { %1420 = vmatpush1.bf16.msra.mxu1 %v1956_v62  ;;  %v1995_v62 = vld [vmem:[#allocation10 + $0x28] ss:$16 sps:$4 sm:$0xff]  }
 0x1e2   :  { %1422 = vmatprep.subr.bf16.mxu1 %v1957_v63  ;;  %v1999_v63 = vld [vmem:[#allocation10 + $0x4c] ss:$16 sps:$4 sm:$0xff]  }
 0x1e5   :  { %1424 = vmatpush1.bf16.msra.mxu1 %v1959_v0  ;;  %v2001_v0 = vld [vmem:[#allocation10 + $0x48] ss:$16 sps:$4 sm:$0xff]  }
 0x1e6   :  { %1426 = vmatprep.subr.bf16.mxu1 %v1960_v1  ;;  %v2005_v1 = vld [vmem:[#allocation10 + $0x6c] ss:$16 sps:$4 sm:$0xff]  }
 0x1e9   :  { %1428 = vmatpush1.bf16.msra.mxu1 %v1962_v2  ;;  %v2007_v2 = vld [vmem:[#allocation10 + $0x68] ss:$16 sps:$4 sm:$0xff]  }
 0x1ea   :  { %1430 = vmatprep.subr.bf16.mxu1 %v1963_v3  ;;  %v2011_v3 = vld [vmem:[#allocation10 + $0x8c] ss:$16 sps:$4 sm:$0xff]  }
 0x1ed   :  { %1432 = vmatpush1.bf16.msra.mxu1 %v1965_v4  ;;  %v2013_v4 = vld [vmem:[#allocation10 + $0x88] ss:$16 sps:$4 sm:$0xff]  }
 0x1ee   :  { %1434 = vmatprep.subr.bf16.mxu1 %v1966_v5  ;;  %v2017_v5 = vld [vmem:[#allocation10 + $0xac] ss:$16 sps:$4 sm:$0xff]  }
 0x1f1   :  { %1436 = vmatpush1.bf16.msra.mxu1 %v1968_v6  ;;  %v2019_v6 = vld [vmem:[#allocation10 + $0xa8] ss:$16 sps:$4 sm:$0xff]  }
 0x1f2   :  { %1438 = vmatprep.subr.bf16.mxu1 %v1969_v7  ;;  %v2023_v7 = vld [vmem:[#allocation10 + $0xcc] ss:$16 sps:$4 sm:$0xff]  }
 0x1f5   :  { %1440 = vmatpush1.bf16.msra.mxu1 %v1971_v8  ;;  %v2025_v8 = vld [vmem:[#allocation10 + $0xc8] ss:$16 sps:$4 sm:$0xff]  }
 0x1f6   :  { %1442 = vmatprep.subr.bf16.mxu1 %v1972_v9  ;;  %v2029_v9 = vld [vmem:[#allocation10 + $0xec] ss:$16 sps:$4 sm:$0xff]  }
 0x1f9   :  { %1444 = vmatpush1.bf16.msra.mxu1 %v1974_v10  ;;  %v2031_v10 = vld [vmem:[#allocation10 + $0xe8] ss:$16 sps:$4 sm:$0xff]  }
 0x1fa   :  { %1446 = vmatprep.subr.bf16.mxu1 %v1975_v11  ;;  %v2035_v11 = vld [vmem:[#allocation10 + $0x10c] ss:$16 sps:$4 sm:$0xff]  }
 0x1fd   :  { %1448 = vmatpush1.bf16.msra.mxu1 %v1977_v12  ;;  %v2037_v12 = vld [vmem:[#allocation10 + $0x108] ss:$16 sps:$4 sm:$0xff]  }
 0x1fe   :  { %1450 = vmatprep.subr.bf16.mxu1 %v1978_v13  ;;  %v2041_v13 = vld [vmem:[#allocation10 + $0x12c] ss:$16 sps:$4 sm:$0xff]  }
 0x201   :  { %1452 = vmatpush1.bf16.msra.mxu1 %v1980_v14  ;;  %v2043_v14 = vld [vmem:[#allocation10 + $0x128] ss:$16 sps:$4 sm:$0xff]  }
 0x202   :  { %1454 = vmatprep.subr.bf16.mxu1 %v1981_v15  ;;  %v2047_v15 = vld [vmem:[#allocation10 + $0x14c] ss:$16 sps:$4 sm:$0xff]  }
 0x205   :  { %1456 = vmatpush1.bf16.msra.mxu1 %v1983_v16  ;;  %v2049_v16 = vld [vmem:[#allocation10 + $0x148] ss:$16 sps:$4 sm:$0xff]  }
 0x206   :  { %1522 = vmatprep.subr.bf16.mxu1 %v1987_v19  ;;  %v2059_v19 = vld [vmem:[#allocation10 + $0x18c] ss:$16 sps:$4 sm:$0xff]  }
 0x29b   :  { %v632_v54 = vpop.f32.mrb[0].mxu1 }
 0x29c   :  { %v633_v55 = vadd.f32 %v632_v54, %v559_v52  ;;  %v634_v56 = vpop.f32.mrb[1].mxu1 }
 0x29d   :  { %v635_v57 = vadd.f32 %v634_v56, %v563_v53 }
 0x29e   :  { %v637_v60 = vmax.f32 %v633_v55, 0.0 }
 0x29f   :  { %v638_v58 = vmax.f32 %v635_v57, 0.0 }
 0x2a1   :  { %812 = vmatprep.mubr.f32.mxu1 %v638_v58 }
 0x2a2   :  { %813 = vmatmul.mubr.f32.vlgmr.msra.gmra.mrb[2].mxu1 %v637_v60 }
 0x2a3   :  { %1524 = vmatpush1.bf16.msra.mxu1 %v1989_v59 }
 0x2a4   :  { %1526 = vmatprep.subr.bf16.mxu1 %v1993_v61 }
 0x2a7   :  { %1528 = vmatpush1.bf16.msra.mxu1 %v1995_v62 }
 0x2a8   :  { %1530 = vmatprep.subr.bf16.mxu1 %v1999_v63 }
 0x2ab   :  { %1532 = vmatpush1.bf16.msra.mxu1 %v2001_v0 }
 0x2ac   :  { %1534 = vmatprep.subr.bf16.mxu1 %v2005_v1 }
 0x2af   :  { %1536 = vmatpush1.bf16.msra.mxu1 %v2007_v2 }
 0x2b0   :  { %1538 = vmatprep.subr.bf16.mxu1 %v2011_v3 }
 0x2b3   :  { %1540 = vmatpush1.bf16.msra.mxu1 %v2013_v4 }
 0x2b4   :  { %1542 = vmatprep.subr.bf16.mxu1 %v2017_v5 }
 0x2b7   :  { %1544 = vmatpush1.bf16.msra.mxu1 %v2019_v6 }
 0x2b8   :  { %1546 = vmatprep.subr.bf16.mxu1 %v2023_v7 }
 0x2bb   :  { %1548 = vmatpush1.bf16.msra.mxu1 %v2025_v8 }
 0x2bc   :  { %1550 = vmatprep.subr.bf16.mxu1 %v2029_v9 }
 0x2bf   :  { %1552 = vmatpush1.bf16.msra.mxu1 %v2031_v10 }
 0x2c0   :  { %1554 = vmatprep.subr.bf16.mxu1 %v2035_v11 }
 0x2c3   :  { %1556 = vmatpush1.bf16.msra.mxu1 %v2037_v12 }
 0x2c4   :  { %1558 = vmatprep.subr.bf16.mxu1 %v2041_v13 }
 0x2c7   :  { %1560 = vmatpush1.bf16.msra.mxu1 %v2043_v14 }
 0x2c8   :  { %1562 = vmatprep.subr.bf16.mxu1 %v2047_v15 }
 0x2cb   :  { %1564 = vmatpush1.bf16.msra.mxu1 %v2049_v16 }
 0x2cc   :  { %1566 = vmatprep.subr.bf16.mxu1 %v2053_v17 }
 0x2cf   :  { %1568 = vmatpush1.bf16.msra.mxu1 %v2055_v18 }
 0x2d0   :  { %1570 = vmatprep.subr.bf16.mxu1 %v2059_v19 }
 0x2d3   :  { %1572 = vmatpush1.bf16.msra.mxu1 %v2061_v20 }
 0x2d4   :  { %1574 = vmatprep.subr.bf16.mxu1 %v2065_v21 }
 0x2d7   :  { %1576 = vmatpush1.bf16.msra.mxu1 %v2067_v22 }
 0x2d8   :  { %1578 = vmatprep.subr.bf16.mxu1 %v2071_v23 }
 0x2db   :  { %1580 = vmatpush1.bf16.msra.mxu1 %v2073_v24 }
 0x2dc   :  { %1582 = vmatprep.subr.bf16.mxu1 %v2077_v26 }
 0x2df   :  { %1584 = vmatpush1.bf16.msra.mxu1 %v2079_v28 }
 0x375   :  { %v814_v32 = vpop.f32.mrb[2].mxu1 }
 0x376   :  { %v815_v33 = vadd.f32 %v814_v32, %v741_v30  ;;  %v816_v34 = vpop.f32.mrb[3].mxu1 }
 0x377   :  { %v817_v35 = vadd.f32 %v816_v34, %v745_v31 }
 0x378   :  { %v819_v37 = vmax.f32 %v815_v33, 0.0 }
 0x379   :  { %v820_v36 = vmax.f32 %v817_v35, 0.0 }
 0x37b   :  { %1099 = vmatprep.mubr.f32.mxu0 %v820_v36  ;;  %1170 = vmatprep.mubr.f32.mxu1 %v820_v36 }
 0x37c   :  { %1100 = vmatmul.mubr.f32.vlgmr.msra.gmra.mrb[2].mxu0 %v819_v37  ;;  %1171 = vmatmul.mubr.f32.vlgmr.msra.gmra.mrb[4].mxu1 %v819_v37 }
 0x44f   :  { %v1101_v48 = vpop.f32.mrb[2].mxu0  ;;  %v1172_v49 = vpop.f32.mrb[4].mxu1 }
 0x450   :  { %v1102_v50 = vadd.f32 %v1101_v48, %v1018_v44  ;;  %v1173_v51 = vadd.f32 %v1172_v49, %v1026_v45  ;;  %v1103_v52 = vpop.f32.mrb[3].mxu0  ;;  %v1174_v53 = vpop.f32.mrb[5].mxu1 }
 0x451   :  { %v1104_v54 = vadd.f32 %v1103_v52, %v1022_v46  ;;  %v1175_v55 = vadd.f32 %v1174_v53, %v1030_v47 }
 0x452   :  { %1177 = vst [vmem:[#allocation13] sm:$0xff] %v1102_v50  ;;  %1179 = vst [vmem:[#allocation13 + $0x10] sm:$0xff] %v1173_v51 }
 0x453   :  { %1178 = vst [vmem:[#allocation13 + $0x8] sm:$0xff] %v1104_v54  ;;  %1180 = vst [vmem:[#allocation13 + $0x18] sm:$0xff] %v1175_v55 }
 0x454   :  { %2223 = shalt.err (!%p2220_p10)
}
 0x455   :  { %s2224_s10 = scalar_lea.hbm %s2422_s7, 512 }
 0x456   :  { %p2225_p11 = scmp.ne.s32.totalorder %s2422_s7, %s2224_s10  ;;  %p2228_p12 = scmp.lt.u32.totalorder %s2224_s10, %s2422_s7 }
 0x458   :  { %p2230_p13 = pnand %p2228_p12, %p2225_p11 }
 0x45a   :  { %2233 = shalt.err (!%p2230_p13)
}
 0x45b   :  { %1190 = dma.vmem_to_hbm [thread:$0]  %s1188_s29, 512, %s2422_s7, [#allocation4]  }
 0x45c   :  { %2242 = dma.done.wait [#allocation4], 512  }
 0x45d   :  { %2243 = vsyncadd [#allocation4], 4294966784 }
 0x45e   :  { %1194 = vsyncpa [#allocation3], 1 }
 0x45f   :  { %1195 = vsyncpa [#allocation6], 1 }
 0x460   :  { %1196 = vsyncpa [#allocation9], 1 }
 0x461   :  { %1197 = vsyncpa [#allocation12], 1 }
 0x462   :  { %1198 = vsyncpa [#allocation4], 1 }

</bundles_post_ra>
